<compile_context>
chip_gen: v5e
topology: v5e:2x2
jax: 0.10.0
libtpu: 0.0.40
codegen_flags: <defaults>
</compile_context>

<pallas_src>
import functools

import jax
import jax.numpy as jnp
from jax.experimental import pallas as pl
from jax.experimental.pallas import tpu as pltpu


def _round_up(x: int, n: int) -> int:
    return ((x + n - 1) // n) * n


def _cdiv(a: int, b: int) -> int:
    return (a + b - 1) // b


def _vmem_limit_bytes() -> int:
    """Generation-aware VMEM limit: ~3/4 of physical capacity.

    -> ~96 MiB on v5e/v6e (128 MiB parts), ~48 MiB on v7x (64 MiB), leaving
    headroom for the materialized h intermediate and compiler internal scratch.
    """
    try:
        cap = int(pltpu.get_tpu_info().vmem_capacity_bytes)
    except Exception:
        cap = 64 << 20
    return (cap * 3) // 4


def _choose_tm(m: int, tm: int) -> int:
    """Token tile: large (MXU / weight-traffic amortization), multiple of
    16 (bf16 sublane pack) / 256 (MXU), and >= 2 tiles for megacore when the
    problem is big enough."""
    if m <= 256:
        return min(tm, _round_up(m, 16))
    t = min(tm, _round_up(m, 256))
    if _cdiv(m, t) < 2:                       # keep >=2 token tiles (2 TensorCores)
        t = max(256, _round_up(_cdiv(m, 2), 256))
    return t


def _choose_tk(d_inner_p: int, tk: int) -> int:
    """Largest multiple of 128 that divides d_inner_p and is <= tk."""
    cap = max(128, min(tk, d_inner_p))
    cap = (cap // 128) * 128
    for t in range(cap, 127, -128):
        if d_inner_p % t == 0:
            return t
    return 128


# ----------------------------- kernel bodies -----------------------------

def _ffn_resident_kernel(x_ref, w1_ref, b1_ref, w2_ref, b2_ref, o_ref):
    """Weights fully VMEM-resident: single pass over W1/W2, no reduction axis."""
    h = jnp.dot(x_ref[...], w1_ref[...], preferred_element_type=jnp.float32)
    h = jnp.maximum(h + b1_ref[...], 0.0)
    # TODO(synk): Dropout omitted (eval-mode identity); add pltpu.prng_* masking for training.
    out = jnp.dot(h.astype(w2_ref.dtype), w2_ref[...],
                  preferred_element_type=jnp.float32)
    o_ref[...] = (out + b2_ref[...]).astype(o_ref.dtype)


def _ffn_stream_kernel_acc(x_ref, w1_ref, b1_ref, w2_ref, b2_ref, o_ref, acc_ref):
    """Streaming d_inner slabs, f32 VMEM accumulator (non-f32 output dtype)."""
    k = pl.program_id(1)

    @pl.when(k == 0)
    def _():
        acc_ref[...] = jnp.zeros_like(acc_ref)

    h = jnp.dot(x_ref[...], w1_ref[...], preferred_element_type=jnp.float32)
    h = jnp.maximum(h + b1_ref[...], 0.0)
    acc_ref[...] += jnp.dot(h.astype(w2_ref.dtype), w2_ref[...],
                            preferred_element_type=jnp.float32)

    @pl.when(k == pl.num_programs(1) - 1)
    def _():
        o_ref[...] = (acc_ref[...] + b2_ref[...]).astype(o_ref.dtype)


def _ffn_stream_kernel_f32(x_ref, w1_ref, b1_ref, w2_ref, b2_ref, o_ref):
    """Streaming d_inner slabs, accumulating directly into the f32 output tile
    (no separate scratch / finalize copy)."""
    k = pl.program_id(1)

    @pl.when(k == 0)
    def _():
        o_ref[...] = jnp.broadcast_to(b2_ref[...], o_ref.shape)

    h = jnp.dot(x_ref[...], w1_ref[...], preferred_element_type=jnp.float32)
    h = jnp.maximum(h + b1_ref[...], 0.0)
    o_ref[...] += jnp.dot(h.astype(w2_ref.dtype), w2_ref[...],
                          preferred_element_type=jnp.float32)


# ----------------------------- host wrappers -----------------------------

def prepare_ff_params(w1, b1, w2, b2, compute_dtype=jnp.bfloat16):
    """Pad weights to lane-dense multiples of 128 and cast ONCE (cache result).

    Padded rows/cols are zero; relu(0)=0 contributes exactly 0 through W2,
    so the padding is numerically exact."""
    d_model, d_inner = w1.shape
    d_model_p = _round_up(d_model, 128)
    d_inner_p = _round_up(d_inner, 128)

    def pad2(a, r, c):
        return a if a.shape == (r, c) else jnp.pad(
            a, ((0, r - a.shape[0]), (0, c - a.shape[1])))

    def pad1(a, n):
        return a if a.shape[0] == n else jnp.pad(a, (0, n - a.shape[0]))

    w1_p = pad2(w1, d_model_p, d_inner_p).astype(compute_dtype)
    w2_p = pad2(w2, d_inner_p, d_model_p).astype(compute_dtype)
    b1_p = pad1(b1, d_inner_p).reshape(1, d_inner_p).astype(jnp.float32)
    b2_p = pad1(b2, d_model_p).reshape(1, d_model_p).astype(jnp.float32)
    return w1_p, b1_p, w2_p, b2_p


@functools.partial(jax.jit, static_argnames=("tm", "tk", "variant"))
def positionwise_ff_prepared(inp, w1_p, b1_p, w2_p, b2_p, *,
                             tm=512, tk=1024, variant="auto"):
    """inp: (seq_len, batch, d_model) -> (seq_len, batch, d_model).

    Weights must already be padded/cast via prepare_ff_params.
    variant: "auto" | "resident" | "stream"."""
    seq_len, batch, d_model = inp.shape
    d_model_p, d_inner_p = w1_p.shape
    m = seq_len * batch

    in_b = jnp.dtype(w1_p.dtype).itemsize
    out_b = jnp.dtype(inp.dtype).itemsize
    f32_out = jnp.dtype(inp.dtype) == jnp.float32

    vmem_limit = _vmem_limit_bytes()
    budget = (vmem_limit * 17) // 20          # ~85%: headroom for rough estimate

    tm_eff = _choose_tm(m, tm)

    def resident_bytes(tm_):
        return (2 * tm_ * d_model_p * (in_b + out_b)       # x + out double-buffers
                + 2 * 2 * d_model_p * d_inner_p * in_b     # W1 + W2 (2 bufs, conservative)
                + tm_ * d_inner_p * 4                      # f32 h intermediate
                + 8 * (d_inner_p + d_model_p))             # biases

    # ---- variant selection (shapes & budget are trace-time constants) ----
    if variant == "resident":
        use_resident = True
    elif variant == "stream":
        use_resident = False
    else:
        use_resident = False
        t = tm_eff
        while True:
            if resident_bytes(t) <= budget:
                tm_eff, use_resident = t, True
                break
            if t <= 256:
                break
            t = max(256, (t // 2 // 128) * 128)

    tk_eff = d_inner_p
    if not use_resident:
        tk_eff = _choose_tk(d_inner_p, tk)

        def stream_bytes(tm_, tk_):
            return (2 * tm_ * d_model_p * (in_b + out_b)    # x + out double-buffers
                    + 2 * 2 * d_model_p * tk_ * in_b        # W1 + W2 slab double-buffers
                    + tm_ * tk_ * 4                         # f32 h intermediate
                    + (0 if f32_out else tm_ * d_model_p * 4)   # acc scratch
                    + 8 * (tk_ + d_model_p))                # biases

        while stream_bytes(tm_eff, tk_eff) > budget and tk_eff > 128:
            tk_eff = _choose_tk(d_inner_p, tk_eff - 128)
        while stream_bytes(tm_eff, tk_eff) > budget and tm_eff > 256:
            tm_eff = max(256, (tm_eff // 2 // 128) * 128)

    m_p = _round_up(m, tm_eff)

    # ---- pad + cast activations (skip pads that are no-ops) ----
    x2d = inp.reshape(m, d_model)
    if (m_p, d_model_p) != (m, d_model):
        x2d = jnp.pad(x2d, ((0, m_p - m), (0, d_model_p - d_model)))
    x2d = x2d.astype(w1_p.dtype)

    # ---- cost estimate accounting for actual weight streaming passes ----
    w_passes = 1 if use_resident else (m_p // tm_eff)
    cost = pl.CostEstimate(
        flops=4 * m * d_model * d_inner_p,                   # two GEMMs (unpadded tokens)
        transcendentals=0,
        bytes_accessed=(m_p * d_model_p * in_b                      # x
                        + w_passes * 2 * d_model_p * d_inner_p * in_b   # W1 + W2 streams
                        + m_p * d_model_p * out_b))                 # out

    if use_resident:
        grid = (m_p // tm_eff,)
        out2d = pl.pallas_call(
            _ffn_resident_kernel,
            out_shape=jax.ShapeDtypeStruct((m_p, d_model_p), inp.dtype),
            grid_spec=pltpu.PrefetchScalarGridSpec(
                num_scalar_prefetch=0,
                grid=grid,
                in_specs=[
                    pl.BlockSpec((tm_eff, d_model_p), lambda i: (i, 0)),      # x tile
                    pl.BlockSpec((d_model_p, d_inner_p), lambda i: (0, 0)),   # W1 (resident)
                    pl.BlockSpec((1, d_inner_p), lambda i: (0, 0)),           # b1
                    pl.BlockSpec((d_inner_p, d_model_p), lambda i: (0, 0)),   # W2 (resident)
                    pl.BlockSpec((1, d_model_p), lambda i: (0, 0)),           # b2
                ],
                out_specs=pl.BlockSpec((tm_eff, d_model_p), lambda i: (i, 0)),
            ),
            compiler_params=pltpu.CompilerParams(
                dimension_semantics=("parallel",),
                vmem_limit_bytes=vmem_limit),
            cost_estimate=cost,
        )(x2d, w1_p, b1_p, w2_p, b2_p)
    else:
        grid = (m_p // tm_eff, d_inner_p // tk_eff)          # reduction axis last
        kernel = _ffn_stream_kernel_f32 if f32_out else _ffn_stream_kernel_acc
        scratch = [] if f32_out else [pltpu.VMEM((tm_eff, d_model_p), jnp.float32)]
        out2d = pl.pallas_call(
            kernel,
            out_shape=jax.ShapeDtypeStruct((m_p, d_model_p), inp.dtype),
            grid_spec=pltpu.PrefetchScalarGridSpec(
                num_scalar_prefetch=0,
                grid=grid,
                in_specs=[
                    pl.BlockSpec((tm_eff, d_model_p), lambda i, k: (i, 0)),   # x tile (resident over k)
                    pl.BlockSpec((d_model_p, tk_eff), lambda i, k: (0, k)),   # W1 column slab
                    pl.BlockSpec((1, tk_eff),         lambda i, k: (0, k)),   # b1 slab
                    pl.BlockSpec((tk_eff, d_model_p), lambda i, k: (k, 0)),   # W2 row slab
                    pl.BlockSpec((1, d_model_p),      lambda i, k: (0, 0)),   # b2
                ],
                out_specs=pl.BlockSpec((tm_eff, d_model_p), lambda i, k: (i, 0)),
                scratch_shapes=scratch,
            ),
            compiler_params=pltpu.CompilerParams(
                dimension_semantics=("parallel", "arbitrary"),
                vmem_limit_bytes=vmem_limit),
            cost_estimate=cost,
        )(x2d, w1_p, b1_p, w2_p, b2_p)

    return out2d[:m, :d_model].reshape(seq_len, batch, d_model)


def positionwise_ff(inp, w1, b1, w2, b2, *, tm=512, tk=1024,
                    compute_dtype=jnp.bfloat16, variant="auto"):
    """Convenience path (pads/casts weights per call).  For repeated calls,
    run prepare_ff_params once and use positionwise_ff_prepared."""
    params = prepare_ff_params(w1, b1, w2, b2, compute_dtype)
    return positionwise_ff_prepared(inp, *params, tm=tm, tk=tk, variant=variant)


def init_params(key, d_model, d_inner, dtype=jnp.float32):
    """Deterministic init mimicking nn.Linear default (uniform +-1/sqrt(fan_in))."""
    k1, k2, k3, k4 = jax.random.split(key, 4)
    lim1 = 1.0 / (d_model ** 0.5)
    lim2 = 1.0 / (d_inner ** 0.5)
    w1 = jax.random.uniform(k1, (d_model, d_inner), dtype, -lim1, lim1)
    b1 = jax.random.uniform(k2, (d_inner,), dtype, -lim1, lim1)
    w2 = jax.random.uniform(k3, (d_inner, d_model), dtype, -lim2, lim2)
    b2 = jax.random.uniform(k4, (d_model,), dtype, -lim2, lim2)
    return w1, b1, w2, b2


if __name__ == "__main__":
    d_model, d_inner = 32, 64
    seq_len, batch = 8, 2

    key = jax.random.PRNGKey(0)
    kx, kp = jax.random.split(key)
    inp = jax.random.normal(kx, (seq_len, batch, d_model), jnp.float32)
    w1, b1, w2, b2 = init_params(kp, d_model, d_inner)

    # Reference (pure JAX f32, eval-mode dropout = identity).
    ref = jnp.maximum(inp @ w1 + b1, 0.0) @ w2 + b2

    # Prepare (pad + bf16-cast) weights ONCE; reuse across calls.
    params = prepare_ff_params(w1, b1, w2, b2)

    out_resident = jax.block_until_ready(
        positionwise_ff_prepared(inp, *params, variant="resident"))
    out_stream = jax.block_until_ready(
        positionwise_ff_prepared(inp, *params, variant="stream"))
    out_auto = jax.block_until_ready(positionwise_ff(inp, w1, b1, w2, b2))

    for out in (out_resident, out_stream, out_auto):
        assert out.shape == inp.shape
        # bf16 MXU operands with f32 accumulation -> relaxed tolerance vs f32 ref.
        assert jnp.allclose(out, ref, atol=2e-2, rtol=2e-2)

    print("KERNEL_OK")
</pallas_src>

<mosaic_0001>
module attributes {stable_mosaic.version = 11 : i64} {
  func.func @_ffn_resident_kernel(%arg0: i32, %arg1: memref<16x128xbf16, #tpu.memory_space<vmem>>, %arg2: memref<128x128xbf16, #tpu.memory_space<vmem>>, %arg3: memref<1x128xf32, #tpu.memory_space<vmem>>, %arg4: memref<128x128xbf16, #tpu.memory_space<vmem>>, %arg5: memref<1x128xf32, #tpu.memory_space<vmem>>, %arg6: memref<16x128xf32, #tpu.memory_space<vmem>>) attributes {dimension_semantics = [#tpu.dimension_semantics<parallel>], iteration_bounds = array<i64: 1>, scalar_prefetch = 0 : i64, scratch_operands = 0 : i64, tpu.core_type = #tpu.core_type<tc>, window_params = [{transform_indices = @transform_0, window_bounds = array<i64: 16, 128>}, {pipeline_mode = #tpu.pipeline_mode<synchronous>, transform_indices = @transform_1, window_bounds = array<i64: 128, 128>}, {pipeline_mode = #tpu.pipeline_mode<synchronous>, transform_indices = @transform_2, window_bounds = array<i64: 1, 128>}, {pipeline_mode = #tpu.pipeline_mode<synchronous>, transform_indices = @transform_3, window_bounds = array<i64: 128, 128>}, {pipeline_mode = #tpu.pipeline_mode<synchronous>, transform_indices = @transform_4, window_bounds = array<i64: 1, 128>}, {transform_indices = @transform_5, window_bounds = array<i64: 16, 128>}]} {
    %c0 = arith.constant 0 : index
    %c0_0 = arith.constant 0 : index
    %0 = vector.load %arg1[%c0, %c0_0] : memref<16x128xbf16, #tpu.memory_space<vmem>>, vector<16x128xbf16>
    %c0_1 = arith.constant 0 : index
    %c0_2 = arith.constant 0 : index
    %1 = vector.load %arg2[%c0_1, %c0_2] : memref<128x128xbf16, #tpu.memory_space<vmem>>, vector<128x128xbf16>
    %cst = arith.constant dense<0.000000e+00> : vector<16x128xf32>
    %2 = tpu.matmul %0, %1, %cst {dimension_numbers = #tpu.dot_dimension_numbers<[1], [0], [0], [1], [0, 0, 1, 1], [], []>} : vector<16x128xbf16>, vector<128x128xbf16>, vector<16x128xf32> -> vector<16x128xf32>
    %c0_3 = arith.constant 0 : index
    %c0_4 = arith.constant 0 : index
    %3 = vector.load %arg3[%c0_3, %c0_4] : memref<1x128xf32, #tpu.memory_space<vmem>>, vector<1x128xf32>
    %4 = vector.broadcast %3 : vector<1x128xf32> to vector<16x128xf32>
    %5 = arith.addf %2, %4 : vector<16x128xf32>
    %cst_5 = arith.constant 0.000000e+00 : f32
    %6 = vector.broadcast %cst_5 : f32 to vector<16x128xf32>
    %7 = arith.maximumf %5, %6 : vector<16x128xf32>
    %8 = arith.truncf %7 : vector<16x128xf32> to vector<16x128xbf16>
    %c0_6 = arith.constant 0 : index
    %c0_7 = arith.constant 0 : index
    %9 = vector.load %arg4[%c0_6, %c0_7] : memref<128x128xbf16, #tpu.memory_space<vmem>>, vector<128x128xbf16>
    %cst_8 = arith.constant dense<0.000000e+00> : vector<16x128xf32>
    %10 = tpu.matmul %8, %9, %cst_8 {dimension_numbers = #tpu.dot_dimension_numbers<[1], [0], [0], [1], [0, 0, 1, 1], [], []>} : vector<16x128xbf16>, vector<128x128xbf16>, vector<16x128xf32> -> vector<16x128xf32>
    %c0_9 = arith.constant 0 : index
    %c0_10 = arith.constant 0 : index
    %11 = vector.load %arg5[%c0_9, %c0_10] : memref<1x128xf32, #tpu.memory_space<vmem>>, vector<1x128xf32>
    %12 = vector.broadcast %11 : vector<1x128xf32> to vector<16x128xf32>
    %13 = arith.addf %10, %12 : vector<16x128xf32>
    %c0_11 = arith.constant 0 : index
    %c0_12 = arith.constant 0 : index
    %14 = vector.load %arg6[%c0_11, %c0_12] : memref<16x128xf32, #tpu.memory_space<vmem>>, vector<16x128xf32>
    tpu.vector_store %arg6[%c0_11, %c0_12], %13 {strides = array<i32>} : memref<16x128xf32, #tpu.memory_space<vmem>>, vector<16x128xf32>,
    return
  }
  func.func @transform_0(%arg0: i32) -> (i32, i32) {
    %c0_i32 = arith.constant 0 : i32
    %c0_i32_0 = arith.constant 0 : i32
    return %arg0, %c0_i32 : i32, i32
  }
  func.func @transform_1(%arg0: i32) -> (i32, i32) {
    %c0_i32 = arith.constant 0 : i32
    %c0_i32_0 = arith.constant 0 : i32
    %c0_i32_1 = arith.constant 0 : i32
    return %c0_i32, %c0_i32_0 : i32, i32
  }
  func.func @transform_2(%arg0: i32) -> (i32, i32) {
    %c0_i32 = arith.constant 0 : i32
    %c0_i32_0 = arith.constant 0 : i32
    %c0_i32_1 = arith.constant 0 : i32
    return %c0_i32, %c0_i32_0 : i32, i32
  }
  func.func @transform_3(%arg0: i32) -> (i32, i32) {
    %c0_i32 = arith.constant 0 : i32
    %c0_i32_0 = arith.constant 0 : i32
    %c0_i32_1 = arith.constant 0 : i32
    return %c0_i32, %c0_i32_0 : i32, i32
  }
  func.func @transform_4(%arg0: i32) -> (i32, i32) {
    %c0_i32 = arith.constant 0 : i32
    %c0_i32_0 = arith.constant 0 : i32
    %c0_i32_1 = arith.constant 0 : i32
    return %c0_i32, %c0_i32_0 : i32, i32
  }
  func.func @transform_5(%arg0: i32) -> (i32, i32) {
    %c0_i32 = arith.constant 0 : i32
    %c0_i32_0 = arith.constant 0 : i32
    return %arg0, %c0_i32 : i32, i32
  }
}

</mosaic_0001>

<bundles_post_ra>
// kernel: positionwise_ff_prepared.1
= control target key start
LH: loop header
LB: loop body
LE: loop exit
PB: predicated region body
PF: predicated region fallthrough
CT: control target
= control target key end

     0   :  { %10 = vsyncpa [#allocation3], 0  ;;  %s477_s0 = inlined_call_operand.vmem [shape: bf16[16,128], index: 0, kind: input, shape index: {}]   ;;  %s478_s1 = inlined_call_operand.hbm [shape: bf16[128,128], index: 1, kind: input, shape index: {}]   ;;  %s479_s2 = inlined_call_operand.vmem [shape: f32[1,128], index: 2, kind: input, shape index: {}]   ;;  %s480_s3 = inlined_call_operand.hbm [shape: bf16[128,128], index: 3, kind: input, shape index: {}]   ;;  %s481_s4 = inlined_call_operand.vmem [shape: f32[1,128], index: 4, kind: input, shape index: {}]   ;;  %s482_s5 = inlined_call_operand.hbm [shape: f32[16,128], index: 5, kind: output, shape index: {}]  }
   0x1   :  { %11 = vsyncpa [#allocation6], 0 }
   0x2   :  { %12 = vsyncpa [#allocation4], 0  ;;  %s19_s20 = sshll.u32 %s478_s1, 4  ;;  %s422_s21 = smov [#allocation2]   ;;  %s20_s20 = int_to_ptr.hbm [resolvable:$true] %s19_s20 }
   0x3   :  { %s21_s22 = sshll.u32 %s422_s21, 4  ;;  %s34_s25 = sshll.u32 %s480_s3, 4  ;;  %s22_s22 = int_to_ptr.vmem [resolvable:$true] %s21_s22  ;;  %s35_s25 = int_to_ptr.hbm [resolvable:$true] %s34_s25 }
   0x4   :  { %s423_s26 = smov 64   ;;  %s424_s27 = smov 4  }
   0x5   :  { %27 = dma.hbm_to_vmem [thread:$0]  %s20_s20, 1024, %s22_s22, [#allocation3], %s423_s26, %s423_s26, %s424_s27  }
   0x6   :  { %s425_s28 = smov [#allocation5]  }
   0x7   :  { %s36_s29 = sshll.u32 %s425_s28, 4  ;;  %s37_s29 = int_to_ptr.vmem [resolvable:$true] %s36_s29 }
   0x8   :  { %42 = dma.hbm_to_vmem [thread:$0]  %s35_s25, 1024, %s37_s29, [#allocation6], %s423_s26, %s423_s26, %s424_s27  }
   0x9   :  { %416 = dma.done.wait [#allocation3], 1024  }
   0xa   :  { %417 = vsyncadd [#allocation3], 4294966272 }
   0xb   :  { %418 = dma.done.wait [#allocation6], 1024  }
   0xc   :  { %419 = vsyncadd [#allocation6], 4294966272  ;;  %v326_v0 = vld [vmem:[#allocation2 + $0x38] sm:$0xff]  ;;  %v325_v1 = vld [vmem:[#allocation2 + $0x30] sm:$0xff]  ;;  %s426_s8 = smov [#allocation7]   ;;  %s427_s12 = smov 128  }
   0xd   :  { %129 = vmatpush.bf16.msra.mxu0 %v326_v0  ;;  %v334_v2 = vld [vmem:[#allocation5 + $0x38] sm:$0xff]  ;;  %v333_v3 = vld [vmem:[#allocation5 + $0x30] sm:$0xff]  ;;  %v324_v4 = vld [vmem:[#allocation2 + $0x28] sm:$0xff]  ;;  %s234_s9 = sshll.u32 %s426_s8, 4  ;;  %s428_s13 = smov 8   ;;  %s235_s9 = int_to_ptr.vmem [resolvable:$true] %s234_s9 }
   0xe   :  { %214 = vmatpush.bf16.msra.mxu1 %v334_v2  ;;  %v332_v5 = vld [vmem:[#allocation5 + $0x28] sm:$0xff]  ;;  %v323_v6 = vld [vmem:[#allocation2 + $0x20] sm:$0xff]  ;;  %v322_v8 = vld [vmem:[#allocation2 + $0x18] sm:$0xff] }
   0xf   :  { %v331_v7 = vld [vmem:[#allocation5 + $0x20] sm:$0xff]  ;;  %v321_v9 = vld [vmem:[#allocation2 + $0x10] sm:$0xff]  ;;  %v320_v10 = vld [vmem:[#allocation2 + $0x8] sm:$0xff] }
  0x10   :  { %v319_v11 = vld [vmem:[#allocation2] sm:$0xff]  ;;  %v330_v13 = vld [vmem:[#allocation5 + $0x18] sm:$0xff]  ;;  %v329_v14 = vld [vmem:[#allocation5 + $0x10] sm:$0xff] }
  0x11   :  { %130 = vmatpush.bf16.msra.mxu0 %v325_v1  ;;  %v318_v12 = vld [vmem:[%s477_s0] sm:$0xff]  ;;  %v328_v15 = vld [vmem:[#allocation5 + $0x8] sm:$0xff] }
  0x12   :  { %215 = vmatpush.bf16.msra.mxu1 %v333_v3  ;;  %v327_v16 = vld [vmem:[#allocation5] sm:$0xff] }
  0x13   :  { %v342_v18 = vld [vmem:[%s479_s2] ss:$0 sm:$0xff]  ;;  %s236_s2 = sshll.u32 %s482_s5, 4  ;;  %s237_s2 = int_to_ptr.hbm [resolvable:$true] %s236_s2 }
  0x14   :  { %v343_v25 = vld [vmem:[%s481_s4] ss:$0 sm:$0xff] }
  0x15   :  { %131 = vmatpush.bf16.msra.mxu0 %v324_v4 }
  0x16   :  { %216 = vmatpush.bf16.msra.mxu1 %v332_v5 }
  0x19   :  { %132 = vmatpush.bf16.msra.mxu0 %v323_v6 }
  0x1a   :  { %217 = vmatpush.bf16.msra.mxu1 %v331_v7 }
  0x1d   :  { %133 = vmatpush.bf16.msra.mxu0 %v322_v8 }
  0x1e   :  { %218 = vmatpush.bf16.msra.mxu1 %v330_v13 }
  0x21   :  { %134 = vmatpush.bf16.msra.mxu0 %v321_v9 }
  0x22   :  { %219 = vmatpush.bf16.msra.mxu1 %v329_v14 }
  0x25   :  { %135 = vmatpush.bf16.msra.mxu0 %v320_v10 }
  0x26   :  { %220 = vmatpush.bf16.msra.mxu1 %v328_v15 }
  0x29   :  { %136 = vmatpush.bf16.msra.mxu0 %v319_v11 }
  0x2a   :  { %221 = vmatpush.bf16.msra.mxu1 %v327_v16 }
  0x2c   :  { %137 = vmatmul.bf16.vlgmr.msra.gmra.mxu0 %v318_v12 }
  0xa9   :  { %v138_v17 = vpop.f32.mrf.mxu0 }
  0xaa   :  { %v139_v19 = vadd.f32 %v342_v18, %v138_v17 }
  0xac   :  { %v143_v22 = vmax.f32 %v139_v19, 0.0 }
  0xb1   :  { %v140_v20 = vpop.f32.mrf.mxu0 }
  0xb2   :  { %v141_v21 = vadd.f32 %v342_v18, %v140_v20 }
  0xb4   :  { %v144_v23 = vmax.f32 %v141_v21, 0.0 }
  0xb6   :  { %v145_v24 = vpack.c.bf16 %v144_v23, %v143_v22 }
  0xb8   :  { %222 = vmatmul.bf16.vlgmr.msra.gmra.mxu1 %v145_v24 }
 0x135   :  { %v223_v26 = vpop.f32.mrf.mxu1 }
 0x136   :  { %v224_v27 = vadd.f32 %v343_v25, %v223_v26 }
 0x138   :  { %228 = vst [vmem:[#allocation7] sm:$0xff] %v224_v27 }
 0x13d   :  { %v225_v28 = vpop.f32.mrf.mxu1 }
 0x13e   :  { %v226_v29 = vadd.f32 %v343_v25, %v225_v28 }
 0x140   :  { %229 = vst [vmem:[#allocation7 + $0x8] sm:$0xff] %v226_v29 }
 0x141   :  { %242 = dma.vmem_to_hbm [thread:$0]  %s235_s9, 256, %s237_s2, [#allocation4], %s427_s12, %s427_s12, %s428_s13  }
 0x142   :  { %420 = dma.done.wait [#allocation4], 256  }
 0x143   :  { %421 = vsyncadd [#allocation4], 4294967040 }
 0x144   :  { %247 = vsyncpa [#allocation3], 1 }
 0x145   :  { %248 = vsyncpa [#allocation6], 1 }
 0x146   :  { %249 = vsyncpa [#allocation4], 1 }

</bundles_post_ra>
